<compile_context>
chip_gen: v6e
topology: v6e:2x2x1
jax: 0.10.0
libtpu: 0.0.40
codegen_flags: <defaults>
</compile_context>

<pallas_src>
import jax
import jax.numpy as jnp
from jax.experimental import pallas as pl
from jax.experimental.pallas import tpu as pltpu


_LANES = 256            # output tile minor dim (multiple of 128 -> unmasked vst)
_HALF = _LANES // 2     # uniform tile minor dim (also a multiple of 128)
_MAX_BLOCK_ROWS = 512   # rows per grid step (multiple of 8)


def _round_up(x, m):
    return ((x + m - 1) // m) * m


def _box_muller_kernel(u1_ref, u2_ref, out_ref):
    """Fill out_ref with i.i.d. N(0,1) samples via Box-Muller.

    u1_ref, u2_ref : VMEM f32[block_rows, _HALF]   uniforms in [0, 1)
    out_ref        : VMEM f32[block_rows, _LANES]
    """
    # Map u1 from [0, 1) to (0, 1] so log() stays finite.
    u1 = jnp.float32(1.0) - u1_ref[...]
    u2 = u2_ref[...]
    r = jnp.sqrt(jnp.float32(-2.0) * jnp.log(u1))
    theta = jnp.float32(2.0 * jnp.pi) * u2
    # Both Box-Muller outputs -> two disjoint, 128-aligned lane halves.
    out_ref[:, :_HALF] = r * jnp.cos(theta)
    out_ref[:, _HALF:] = r * jnp.sin(theta)


def _sample_normal_slab(key, total):
    """Return `total` i.i.d. N(0,1) float32 samples as a flat vector."""
    rows = max(1, pl.cdiv(total, _LANES))
    if rows >= _MAX_BLOCK_ROWS:
        block_rows = _MAX_BLOCK_ROWS
    else:
        block_rows = _round_up(rows, 8)
    padded_rows = _round_up(rows, block_rows)
    grid = (padded_rows // block_rows,)

    k1, k2 = jax.random.split(key)
    u1 = jax.random.uniform(k1, (padded_rows, _HALF), dtype=jnp.float32)
    u2 = jax.random.uniform(k2, (padded_rows, _HALF), dtype=jnp.float32)

    z = pl.pallas_call(
        _box_muller_kernel,
        out_shape=jax.ShapeDtypeStruct((padded_rows, _LANES), jnp.float32),
        grid=grid,
        in_specs=[
            pl.BlockSpec((block_rows, _HALF), lambda i: (i, 0)),
            pl.BlockSpec((block_rows, _HALF), lambda i: (i, 0)),
        ],
        out_specs=pl.BlockSpec((block_rows, _LANES), lambda i: (i, 0)),
        compiler_params=pltpu.CompilerParams(
            dimension_semantics=("parallel",),      # megacore sharding on v7x
            vmem_limit_bytes=32 * 1024 * 1024,      # ample headroom, safe on v7x
        ),
    )(u1, u2)

    return z.reshape(-1)[:total]


def _generate_parameters(batch, num_nodes, input_dim, output_dim, key):
    bn = batch * num_nodes
    n_w = bn * input_dim * output_dim
    n_b = bn * output_dim
    flat = _sample_normal_slab(key, n_w + n_b)
    weights = flat[:n_w].reshape(batch, num_nodes, input_dim, output_dim)
    biases = flat[n_w:].reshape(batch, num_nodes, output_dim)
    return weights, biases


class ParameterGenerator:
    """JAX/Pallas port of modules/utils.py::ParameterGenerator."""

    def __init__(self, input_dim, output_dim, num_nodes, seed=0):
        self.input_dim = input_dim
        self.output_dim = output_dim
        self.num_nodes = num_nodes
        self._key = jax.random.PRNGKey(seed)

    def __call__(self, x):
        # Only x.shape[0] is used, exactly like the PyTorch module.
        batch = x.shape[0]
        return _generate_parameters(
            batch, self.num_nodes, self.input_dim, self.output_dim, self._key
        )


if __name__ == "__main__":
    key = jax.random.PRNGKey(0)
    # Small shapes: batch=2, channels=4, spatial=16x16 (input values are unused
    # by the module; only the batch dimension matters).
    x = jax.random.normal(key, (2, 4, 16, 16), dtype=jnp.float32)

    gen = ParameterGenerator(input_dim=16, output_dim=32, num_nodes=4, seed=0)
    weights, biases = gen(x)
    weights = jax.block_until_ready(weights)
    biases = jax.block_until_ready(biases)

    assert weights.shape == (2, 4, 16, 32), weights.shape
    assert biases.shape == (2, 4, 32), biases.shape
    assert weights.dtype == jnp.float32 and biases.dtype == jnp.float32
    # Sanity: samples should look like N(0, 1).
    assert jnp.isfinite(weights).all() and jnp.isfinite(biases).all()
    assert abs(float(weights.mean())) < 0.2
    assert 0.7 < float(weights.std()) < 1.3
    assert abs(float(biases.mean())) < 0.3
    assert 0.6 < float(biases.std()) < 1.4

    print("KERNEL_OK")
</pallas_src>

<mosaic_0001>
module attributes {stable_mosaic.version = 11 : i64} {
  func.func @_box_muller_kernel(%arg0: i32, %arg1: memref<24x128xf32, #tpu.memory_space<vmem>>, %arg2: memref<24x128xf32, #tpu.memory_space<vmem>>, %arg3: memref<24x256xf32, #tpu.memory_space<vmem>>) attributes {dimension_semantics = [#tpu.dimension_semantics<parallel>], iteration_bounds = array<i64: 1>, scalar_prefetch = 0 : i64, scratch_operands = 0 : i64, tpu.core_type = #tpu.core_type<tc>, window_params = [{transform_indices = @transform_0, window_bounds = array<i64: 24, 128>}, {transform_indices = @transform_1, window_bounds = array<i64: 24, 128>}, {transform_indices = @transform_2, window_bounds = array<i64: 24, 256>}]} {
    %c0 = arith.constant 0 : index
    %c0_0 = arith.constant 0 : index
    %0 = vector.load %arg1[%c0, %c0_0] : memref<24x128xf32, #tpu.memory_space<vmem>>, vector<24x128xf32>
    %cst = arith.constant 1.000000e+00 : f32
    %1 = vector.broadcast %cst : f32 to vector<24x128xf32>
    %2 = arith.subf %1, %0 : vector<24x128xf32>
    %c0_1 = arith.constant 0 : index
    %c0_2 = arith.constant 0 : index
    %3 = vector.load %arg2[%c0_1, %c0_2] : memref<24x128xf32, #tpu.memory_space<vmem>>, vector<24x128xf32>
    %4 = math.log %2 : vector<24x128xf32>
    %cst_3 = arith.constant -2.000000e+00 : f32
    %5 = vector.broadcast %cst_3 : f32 to vector<24x128xf32>
    %6 = arith.mulf %5, %4 : vector<24x128xf32>
    %7 = math.sqrt %6 : vector<24x128xf32>
    %cst_4 = arith.constant 6.28318548 : f32
    %8 = vector.broadcast %cst_4 : f32 to vector<24x128xf32>
    %9 = arith.mulf %8, %3 : vector<24x128xf32>
    %10 = math.cos %9 : vector<24x128xf32>
    %11 = arith.mulf %7, %10 : vector<24x128xf32>
    %c0_5 = arith.constant 0 : index
    %c0_6 = arith.constant 0 : index
    %12 = vector.load %arg3[%c0_5, %c0_6] : memref<24x256xf32, #tpu.memory_space<vmem>>, vector<24x128xf32>
    tpu.vector_store %arg3[%c0_5, %c0_6], %11 {strides = array<i32>} : memref<24x256xf32, #tpu.memory_space<vmem>>, vector<24x128xf32>,
    %13 = math.sin %9 : vector<24x128xf32>
    %14 = arith.mulf %7, %13 : vector<24x128xf32>
    %c0_7 = arith.constant 0 : index
    %c128 = arith.constant 128 : index
    %15 = vector.load %arg3[%c0_7, %c128] : memref<24x256xf32, #tpu.memory_space<vmem>>, vector<24x128xf32>
    tpu.vector_store %arg3[%c0_7, %c128], %14 {strides = array<i32>} : memref<24x256xf32, #tpu.memory_space<vmem>>, vector<24x128xf32>,
    return
  }
  func.func @transform_0(%arg0: i32) -> (i32, i32) {
    %c0_i32 = arith.constant 0 : i32
    %c0_i32_0 = arith.constant 0 : i32
    return %arg0, %c0_i32 : i32, i32
  }
  func.func @transform_1(%arg0: i32) -> (i32, i32) {
    %c0_i32 = arith.constant 0 : i32
    %c0_i32_0 = arith.constant 0 : i32
    return %arg0, %c0_i32 : i32, i32
  }
  func.func @transform_2(%arg0: i32) -> (i32, i32) {
    %c0_i32 = arith.constant 0 : i32
    %c0_i32_0 = arith.constant 0 : i32
    return %arg0, %c0_i32 : i32, i32
  }
}

</mosaic_0001>

<bundles_post_ra>
// kernel: tpu_custom_call.1
= control target key start
LH: loop header
LB: loop body
LE: loop exit
PB: predicated region body
PF: predicated region fallthrough
CT: control target
= control target key end

     0   :  { %7 = vsyncpa [#allocation3], 0  ;;  %s1110_s0 = inlined_call_operand.hbm [shape: f32[24,128], index: 0, kind: input, shape index: {}]   ;;  %s1111_s1 = inlined_call_operand.hbm [shape: f32[24,128], index: 1, kind: input, shape index: {}]   ;;  %s1112_s2 = inlined_call_operand.hbm [shape: f32[24,256], index: 2, kind: output, shape index: {}]  }
   0x1   :  { %8 = vsyncpa [#allocation6], 0 }
   0x2   :  { %9 = vsyncpa [#allocation4], 0  ;;  %s872_s9 = smov [#allocation2]  }
   0x3   :  { %s15_s10 = sshll.u32 %s872_s9, 4  ;;  %s16_s10 = int_to_ptr.vmem [resolvable:$true] %s15_s10 }
   0x4   :  { %s814_s11 = scalar_lea.vmem %s16_s10, 384  ;;  %p819_p1 = scmp.lt.s32.totalorder %s16_s10, %s16_s10 }
   0x5   :  { %p815_p0 = scmp.ne.s32.totalorder %s16_s10, %s814_s11  ;;  %p820_p2 = scmp.lt.s32.totalorder %s814_s11, %s814_s11 }
   0x7   :  { %p821_p3 = por %p820_p2, %p819_p1 }
   0x9   :  { %p822_p4 = pnand %p821_p3, %p815_p0 }
   0xb   :  { %825 = shalt.err (!%p822_p4)
}
   0xc   :  { %s873_s12 = smov 128   ;;  %s874_s13 = smov 8  }
   0xd   :  { %21 = dma.hbm_to_vmem [thread:$0]  %s1110_s0, 384, %s16_s10, [#allocation3], %s873_s12, %s873_s12, %s874_s13  }
   0xe   :  { %s875_s16 = smov [#allocation5]  }
   0xf   :  { %s27_s17 = sshll.u32 %s875_s16, 4  ;;  %s28_s17 = int_to_ptr.vmem [resolvable:$true] %s27_s17 }
  0x10   :  { %s834_s18 = scalar_lea.vmem %s28_s17, 384  ;;  %p839_p6 = scmp.lt.s32.totalorder %s28_s17, %s28_s17 }
  0x11   :  { %p835_p5 = scmp.ne.s32.totalorder %s28_s17, %s834_s18  ;;  %p840_p7 = scmp.lt.s32.totalorder %s834_s18, %s834_s18 }
  0x13   :  { %p841_p8 = por %p840_p7, %p839_p6 }
  0x15   :  { %p842_p9 = pnand %p841_p8, %p835_p5 }
  0x17   :  { %845 = shalt.err (!%p842_p9)
}
  0x18   :  { %33 = dma.hbm_to_vmem [thread:$0]  %s1111_s1, 384, %s28_s17, [#allocation6], %s873_s12, %s873_s12, %s874_s13  }
  0x19   :  { %866 = dma.done.wait [#allocation3], 384  }
  0x1a   :  { %867 = vsyncadd [#allocation3], 4294966912 }
  0x1b   :  { %868 = dma.done.wait [#allocation6], 384  }
  0x1c   :  { %869 = vsyncadd [#allocation6], 4294966912  ;;  %v46_v0 = vld [vmem:[#allocation5] sm:$0xff]  ;;  %v47_v2 = vld [vmem:[#allocation5 + $0x8] sm:$0xff]  ;;  %v876_v19 = vmov 683565275  }
  0x1d   :  { %v906_v1 = vmul.f32 6.2831855, %v46_v0  ;;  %v908_v3 = vmul.f32 6.2831855, %v47_v2  ;;  %v40_v11 = vld [vmem:[#allocation2] sm:$0xff]  ;;  %v48_v39 = vld [vmem:[#allocation5 + $0x10] sm:$0xff] }
  0x1e   :  { %v43_v16 = vsub.f32 1.0, %v40_v11  ;;  %v877_v21 = vmov 2475754826   ;;  %v878_v23 = vmov 2131351028   ;;  %s882_s0 = smov [#allocation7]  }
  0x1f   :  { %v85_v4 = vand.u32 2139095040, %v906_v1  ;;  %v188_v6 = vand.u32 2139095040, %v908_v3  ;;  %v82_v8 = vand.u32 2147483647, %v906_v1  ;;  %v879_v25 = vmov 2102212464  }
  0x20   :  { %v880_v27 = vmov 920167782   ;;  %v185_v29 = vand.u32 2147483647, %v908_v3  ;;  %v881_v37 = vmov 1326507024   ;;  %782 = vlog2.f32 %v43_v16 }
  0x21   :  { %v86_v5 = vshrl.u32 %v85_v4, 23  ;;  %v189_v10 = vshrl.u32 %v188_v6, 23  ;;  %v89_v13 = vand.u32 8388607, %v82_v8  ;;  %v927_v46 = vmul.f32 6.2831855, %v48_v39 }
  0x22   :  { %v192_v57 = vand.u32 8388607, %v185_v29  ;;  %vm84_vm14 = vcmp.lt.s32.totalorder %v906_v1, 0  ;;  %vm1004_vm15 = vcmp.le.f32.partialorder %v82_v8, 0.7853982  ;;  %s720_s1 = sshll.u32 %s882_s0, 4  ;;  %s721_s1 = int_to_ptr.vmem [resolvable:$true] %s720_s1 }
  0x23   :  { %v733_v7 = vadd.s32 4294967169, %v86_v5  ;;  %v737_v15 = vadd.s32 4294967169, %v189_v10  ;;  %v90_v30 = vor.u32 8388608, %v89_v13  ;;  %v291_v4 = vand.u32 2139095040, %v927_v46  ;;  %s846_s21 = scalar_lea.vmem %s721_s1, 768  ;;  %p851_p11 = scmp.lt.s32.totalorder %s721_s1, %s721_s1 }
  0x24   :  { %v193_v6 = vor.u32 8388608, %v192_v57  ;;  %p847_p10 = scmp.ne.s32.totalorder %s721_s1, %s846_s21  ;;  %p852_p12 = scmp.lt.s32.totalorder %s846_s21, %s846_s21 }
  0x25   :  { %v92_v9 = vadd.s32 1, %v733_v7  ;;  %v195_v33 = vadd.s32 1, %v737_v15  ;;  %v130_v45 = vshll.u32 %v90_v30, 8 }
  0x26   :  { %p853_p13 = por %p852_p12, %p851_p11 }
  0x27   :  { %vm93_vm0 = vcmp.gt.s32.totalorder %v92_v9, 0  ;;  %vm196_vm5 = vcmp.gt.s32.totalorder %v195_v33, 0 }
  0x28   :  { %v94_v12 = vsel %vm93_vm0, %v92_v9, 0  ;;  %v197_v58 = vsel %vm196_vm5, %v195_v33, 0  ;;  %p854_p0 = pnand %p853_p13, %p847_p10 }
  0x29   :  { %v96_v14 = vand.u32 31, %v94_v12  ;;  %v95_v17 = vshrl.u32 %v94_v12, 5  ;;  %v199_v2 = vand.u32 31, %v197_v58  ;;  %v198_v12 = vshrl.u32 %v197_v58, 5 }
  0x2b   :  { %v97_v18 = vsub.s32 32, %v96_v14  ;;  %v99_v20 = vshll.u32 %v876_v19, %v96_v14  ;;  %v102_v22 = vshll.u32 %v877_v21, %v96_v14  ;;  %v105_v24 = vshll.u32 %v878_v23, %v96_v14 }
  0x2c   :  { %v108_v26 = vshll.u32 %v879_v25, %v96_v14  ;;  %v111_v28 = vshll.u32 %v880_v27, %v96_v14  ;;  %vm114_vm1 = vcmp.lt.s32.totalorder %v95_v17, 1  ;;  %vm117_vm2 = vcmp.lt.s32.totalorder %v95_v17, 4 }
  0x2d   :  { %v100_v31 = vshrl.u32 %v877_v21, %v97_v18  ;;  %v103_v32 = vshrl.u32 %v878_v23, %v97_v18  ;;  %v98_v34 = vshrl.u32 %v876_v19, %v97_v18  ;;  %v106_v35 = vshrl.u32 %v879_v25, %v97_v18 }
  0x2e   :  { %v109_v36 = vshrl.u32 %v880_v27, %v97_v18  ;;  %v112_v38 = vshrl.u32 %v881_v37, %v97_v18  ;;  %vm116_vm3 = vcmp.lt.s32.totalorder %v95_v17, 3  ;;  %vm115_vm4 = vcmp.lt.s32.totalorder %v95_v17, 2 }
  0x2f   :  { %v101_v40 = vor.u32 %v100_v31, %v99_v20  ;;  %v104_v41 = vor.u32 %v103_v32, %v102_v22  ;;  %v107_v42 = vor.u32 %v106_v35, %v105_v24  ;;  %v200_v9 = vsub.s32 32, %v199_v2 }
  0x30   :  { %v110_v43 = vor.u32 %v109_v36, %v108_v26  ;;  %v113_v44 = vor.u32 %v112_v38, %v111_v28  ;;  %v202_v10 = vshll.u32 %v876_v19, %v199_v2  ;;  %v205_v11 = vshll.u32 %v877_v21, %v199_v2 }
  0x31   :  { %v118_v47 = vsel %vm114_vm1, %v98_v34, %v101_v40  ;;  %v119_v48 = vsel %vm117_vm2, %v107_v42, 2102212464  ;;  %v122_v49 = vsel %vm114_vm1, %v101_v40, %v104_v41  ;;  %v126_v53 = vsel %vm114_vm1, %v104_v41, %v107_v42 }
  0x32   :  { %v123_v50 = vsel %vm117_vm2, %v110_v43, 920167782  ;;  %v120_v51 = vsel %vm116_vm3, %v104_v41, %v119_v48  ;;  %v127_v54 = vsel %vm117_vm2, %v113_v44, 1326507024  ;;  %v208_v13 = vshll.u32 %v878_v23, %v199_v2 }
  0x33   :  { %v124_v52 = vsel %vm116_vm3, %v107_v42, %v123_v50  ;;  %v128_v56 = vsel %vm116_vm3, %v110_v43, %v127_v54  ;;  %v121_v59 = vsel %vm115_vm4, %v118_v47, %v120_v51  ;;  %v211_v14 = vshll.u32 %v879_v25, %v199_v2 }
  0x34   :  { %v125_v55 = vsel %vm115_vm4, %v122_v49, %v124_v52  ;;  %v129_v60 = vsel %vm115_vm4, %v126_v53, %v128_v56  ;;  %v137_v5 = vmul.u32 %v130_v45, %v121_v59  ;;  %v203_v16 = vshrl.u32 %v877_v21, %v200_v9  ;;  %v783_v53 = vpop.eup %782 }
  0x35   :  { %v940_v61 = vmul.u32.u64.low %v130_v45, %v125_v55  ;;  %v941_v62 = vmul.u32.u64.high %v130_v45, %v125_v55, %v940_v61  ;;  %v944_v63 = vmul.u32.u64.low %v130_v45, %v129_v60  ;;  %v945_v0 = vmul.u32.u64.high %v130_v45, %v129_v60, %v944_v63 }
  0x36   :  { %v206_v17 = vshrl.u32 %v878_v23, %v200_v9  ;;  %v292_v18 = vshrl.u32 %v291_v4, 23  ;;  %v209_v22 = vshrl.u32 %v879_v25, %v200_v9  ;;  %v212_v24 = vshrl.u32 %v880_v27, %v200_v9 }
  0x37   :  { %v140_v7 = vadd.s32 1, %v941_v62  ;;  %vm139_vm6 = vc.u32 %v945_v0, %v940_v61  ;;  %v214_v26 = vshll.u32 %v880_v27, %v199_v2  ;;  %v201_v28 = vshrl.u32 %v876_v19, %v200_v9 }
  0x38   :  { %v204_v30 = vor.u32 %v203_v16, %v202_v10  ;;  %v207_v31 = vor.u32 %v206_v17, %v205_v11  ;;  %v215_v32 = vshrl.u32 %v881_v37, %v200_v9  ;;  %v210_v34 = vor.u32 %v209_v22, %v208_v13 }
  0x39   :  { %v141_v15 = vsel %vm139_vm6, %v140_v7, %v941_v62  ;;  %v213_v35 = vor.u32 %v212_v24, %v211_v14  ;;  %vm217_vm7 = vcmp.lt.s32.totalorder %v198_v12, 1  ;;  %vm220_vm8 = vcmp.lt.s32.totalorder %v198_v12, 4  ;;  %v41_v62 = vld [vmem:[#allocation2 + $0x8] sm:$0xff] }
  0x3a   :  { %v142_v20 = vadd.s32 %v141_v15, %v137_v5  ;;  %v216_v36 = vor.u32 %v215_v32, %v214_v26  ;;  %vm219_vm9 = vcmp.lt.s32.totalorder %v198_v12, 3  ;;  %v222_v39 = vsel %vm220_vm8, %v210_v34, 2102212464 }
  0x3b   :  { %vm218_vm10 = vcmp.lt.s32.totalorder %v198_v12, 2  ;;  %v225_v40 = vsel %vm217_vm7, %v204_v30, %v207_v31  ;;  %v226_v41 = vsel %vm220_vm8, %v213_v35, 920167782  ;;  %v233_v42 = vshll.u32 %v193_v6, 8 }
  0x3c   :  { %v143_v33 = vadd.s32 536870912, %v142_v20  ;;  %v221_v44 = vsel %vm217_vm7, %v201_v28, %v204_v30  ;;  %v741_v45 = vadd.s32 4294967169, %v292_v18  ;;  %v223_v47 = vsel %vm219_vm9, %v207_v31, %v222_v39 }
  0x3d   :  { %v227_v48 = vsel %vm219_vm9, %v210_v34, %v226_v41  ;;  %v229_v49 = vsel %vm217_vm7, %v207_v31, %v210_v34  ;;  %v230_v50 = vsel %vm220_vm8, %v216_v36, 1326507024  ;;  %v224_v58 = vsel %vm218_vm10, %v221_v44, %v223_v47 }
  0x3e   :  { %v963_v38 = vshrl.u32 %v143_v33, 30  ;;  %v228_v52 = vsel %vm218_vm10, %v225_v40, %v227_v48  ;;  %v231_v54 = vsel %vm219_vm9, %v213_v35, %v230_v50  ;;  %v298_v60 = vadd.s32 1, %v741_v45 }
  0x3f   :  { %v970_v55 = vmul.u32.u64.low %v233_v42, %v228_v52  ;;  %v971_v56 = vmul.u32.u64.high %v233_v42, %v228_v52, %v970_v55  ;;  %v232_v59 = vsel %vm218_vm10, %v229_v49, %v231_v54  ;;  %v240_v5 = vmul.u32 %v233_v42, %v224_v58 }
  0x40   :  { %v145_v43 = vshll.u32 %v963_v38, 30  ;;  %v976_v63 = vmul.u32.u64.low %v233_v42, %v232_v59  ;;  %v977_v2 = vmul.u32.u64.high %v233_v42, %v232_v59, %v976_v63  ;;  %v44_v9 = vsub.f32 1.0, %v41_v62 }
  0x41   :  { %v243_v6 = vadd.s32 1, %v971_v56  ;;  %vm299_vm11 = vcmp.gt.s32.totalorder %v298_v60, 0  ;;  %v50_v10 = vmul.f32 0.6931472, %v783_v53  ;;  %v288_v11 = vand.u32 2147483647, %v927_v46 }
  0x42   :  { %v146_v51 = vsub.s32 %v142_v20, %v145_v43  ;;  %vm242_vm12 = vc.u32 %v977_v2, %v970_v55  ;;  %v300_v12 = vsel %vm299_vm11, %v298_v60, 0  ;;  %v138_v17 = vadd.s32 %v940_v61, %v945_v0 }
  0x43   :  { %v244_v14 = vsel %vm242_vm12, %v243_v6, %v971_v56  ;;  %v302_v15 = vand.u32 31, %v300_v12  ;;  %784 = vlog2.f32 %v44_v9  ;;  %v986_v20 = vmul.f32 -2.0, %v50_v10 }
  0x44   :  { %v148_v57 = vsub.s32 0, %v146_v51  ;;  %v245_v16 = vadd.s32 %v244_v14, %v240_v5  ;;  %v295_v26 = vand.u32 8388607, %v288_v11  ;;  %v301_v32 = vshrl.u32 %v300_v12, 5 }
  0x45   :  { %v303_v18 = vsub.s32 32, %v302_v15  ;;  %v305_v34 = vshll.u32 %v876_v19, %v302_v15  ;;  %v308_v61 = vshll.u32 %v877_v21, %v302_v15  ;;  %v311_v0 = vshll.u32 %v878_v23, %v302_v15 }
  0x46   :  { %v734_v4 = vmin.u32 %v148_v57, %v146_v51  ;;  %v246_v24 = vadd.s32 536870912, %v245_v16  ;;  %v314_v43 = vshll.u32 %v879_v25, %v302_v15  ;;  %v296_v48 = vor.u32 8388608, %v295_v26 }
  0x47   :  { %v306_v39 = vshrl.u32 %v877_v21, %v303_v18  ;;  %v309_v40 = vshrl.u32 %v878_v23, %v303_v18  ;;  %v312_v42 = vshrl.u32 %v879_v25, %v303_v18  ;;  %v315_v44 = vshrl.u32 %v880_v27, %v303_v18 }
  0x48   :  { %v150_v7 = vclz %v734_v4  ;;  %v990_v33 = vshrl.u32 %v246_v24, 30  ;;  %v317_v23 = vshll.u32 %v880_v27, %v302_v15  ;;  %786 = vrsqrt.f32 %v986_v20 }
  0x49   :  { %v304_v50 = vshrl.u32 %v876_v19, %v303_v18  ;;  %v318_v25 = vshrl.u32 %v881_v37, %v303_v18  ;;  %v307_v53 = vor.u32 %v306_v39, %v305_v34  ;;  %v310_v8 = vor.u32 %v309_v40, %v308_v61  ;;  %v42_v39 = vld [vmem:[#allocation2 + $0x10] sm:$0xff] }
  0x4a   :  { %v735_v13 = vadd.s32 4294967294, %v150_v7  ;;  %v248_v41 = vshll.u32 %v990_v33, 30  ;;  %v313_v56 = vor.u32 %v312_v42, %v311_v0  ;;  %v316_v57 = vor.u32 %v315_v44, %v314_v43 }
  0x4b   :  { %vm320_vm0 = vcmp.lt.s32.totalorder %v301_v32, 1  ;;  %v168_v27 = vsub.s32 4, %v963_v38  ;;  %v319_v59 = vor.u32 %v318_v25, %v317_v23  ;;  %v336_v60 = vshll.u32 %v296_v48, 8 }
  0x4c   :  { %vm736_vm13 = vcmp.lt.s32.totalorder %v735_v13, 0  ;;  %v1010_v49 = vsub.s32 %v245_v16, %v248_v41  ;;  %v241_v62 = vadd.s32 %v970_v55, %v977_v2  ;;  %vm321_vm1 = vcmp.lt.s32.totalorder %v301_v32, 2 }
  0x4d   :  { %v153_v22 = vsel %vm736_vm13, 0, %v735_v13  ;;  %vm322_vm2 = vcmp.lt.s32.totalorder %v301_v32, 3  ;;  %vm323_vm3 = vcmp.lt.s32.totalorder %v301_v32, 4  ;;  %v324_v63 = vsel %vm320_vm0, %v304_v50, %v307_v53 }
  0x4e   :  { %v154_v28 = vsub.s32 32, %v153_v22  ;;  %v155_v30 = vshll.u32 %v146_v51, %v153_v22  ;;  %v158_v31 = vsub.s32 4294967266, %v153_v22  ;;  %v251_v54 = vsub.s32 0, %v1010_v49 }
  0x4f   :  { %v328_v4 = vsel %vm320_vm0, %v307_v53, %v310_v8  ;;  %v325_v7 = vsel %vm323_vm3, %v313_v56, 2102212464  ;;  %v329_v9 = vsel %vm323_vm3, %v316_v57, 920167782  ;;  %v332_v10 = vsel %vm320_vm0, %v310_v8, %v313_v56 }
  0x50   :  { %v156_v35 = vshrl.u32 %v138_v17, %v154_v28  ;;  %v159_v36 = vadd.s32 127, %v158_v31  ;;  %v738_v19 = vmin.u32 %v251_v54, %v1010_v49  ;;  %v785_v5 = vpop.eup %784  ;;  %v326_v13 = vsel %vm322_vm2, %v310_v8, %v325_v7 }
  0x51   :  { %v330_v55 = vsel %vm322_vm2, %v313_v56, %v329_v9  ;;  %v333_v2 = vsel %vm323_vm3, %v319_v59, 1326507024  ;;  %v327_v15 = vsel %vm321_vm1, %v324_v63, %v326_v13  ;;  %v169_v34 = vsel %vm84_vm14, %v168_v27, %v963_v38 }
  0x52   :  { %v157_v47 = vor.u32 %v156_v35, %v155_v30  ;;  %v160_v21 = vshll.u32 %v159_v36, 23  ;;  %v253_v6 = vclz %v738_v19  ;;  %v331_v16 = vsel %vm321_vm1, %v328_v4, %v330_v55 }
  0x53   :  { %v334_v17 = vsel %vm322_vm2, %v316_v57, %v333_v2  ;;  %v1030_v24 = vmul.u32.u64.low %v336_v60, %v331_v16  ;;  %v1031_v26 = vmul.u32.u64.high %v336_v60, %v331_v16, %v1030_v24  ;;  %v343_v32 = vmul.u32 %v336_v60, %v327_v15 }
  0x54   :  { %v161_v51 = vor.u32 4788187, %v160_v21  ;;  %v164_v52 = vcvt.s32.f32 %v157_v47  ;;  %v739_v14 = vadd.s32 4294967294, %v253_v6  ;;  %v335_v22 = vsel %vm321_vm1, %v332_v10, %v334_v17 }
  0x55   :  { %v1037_v30 = vmul.u32.u64.low %v336_v60, %v335_v22  ;;  %v1038_v31 = vmul.u32.u64.high %v336_v60, %v335_v22, %v1037_v30  ;;  %v787_v40 = vpop.eup %786  ;;  %v52_v41 = vmul.f32 0.6931472, %v785_v5  ;;  %v346_v42 = vadd.s32 1, %v1031_v26 }
  0x56   :  { %v162_v58 = vand.u32 2147483647, %v161_v51  ;;  %vm740_vm4 = vcmp.lt.s32.totalorder %v739_v14, 0  ;;  %v171_v43 = vsel %vm1004_vm15, 0, %v169_v34  ;;  %v45_v38 = vsub.f32 1.0, %v42_v39 }
  0x57   :  { %v256_v61 = vsel %vm740_vm4, 0, %v739_v14  ;;  %vm345_vm5 = vc.u32 %v1038_v31, %v1030_v24  ;;  %v59_v50 = vmul.f32 %v787_v40, %v986_v20  ;;  %v1051_v25 = vmul.f32 -2.0, %v52_v41 }
  0x58   :  { %v165_v37 = vmul.f32 %v164_v52, %v162_v58  ;;  %v257_v0 = vsub.s32 32, %v256_v61  ;;  %v258_v35 = vshll.u32 %v1010_v49, %v256_v61  ;;  %v261_v36 = vsub.s32 4294967266, %v256_v61 }
  0x59   :  { %v347_v21 = vsel %vm345_vm5, %v346_v42, %v1031_v26  ;;  %v490_v51 = vadd.s32 3, %v171_v43  ;;  %vm60_vm6 = vcmp.eq.f32.partialorder %v986_v20, inf  ;;  %v63_v8 = vand.u32 2147483648, %v986_v20 }
  0x5a   :  { %v166_v12 = vxor.u32 2147483648, %v165_v37  ;;  %v259_v44 = vshrl.u32 %v241_v62, %v257_v0  ;;  %v262_v47 = vadd.s32 127, %v261_v36  ;;  %v348_v49 = vadd.s32 %v347_v21, %v343_v32 }
  0x5b   :  { %v175_v54 = vand.u32 3, %v171_v43  ;;  %v61_v58 = vsel %vm60_vm6, %v986_v20, %v59_v50  ;;  %vm62_vm7 = vcmp.eq.f32.partialorder %v986_v20, 0.0  ;;  %v491_v27 = vand.u32 3, %v490_v51 }
  0x5c   :  { %v167_v18 = vsel %vm84_vm14, %v166_v12, %v165_v37  ;;  %v260_v48 = vor.u32 %v259_v44, %v258_v35  ;;  %v263_v23 = vshll.u32 %v262_v47, 23  ;;  %v349_v53 = vadd.s32 536870912, %v348_v49 }
  0x5d   :  { %v170_v28 = vsel %vm1004_vm15, %v906_v1, %v167_v18  ;;  %v271_v60 = vsub.s32 4, %v990_v33  ;;  %vm174_vm8 = vweird.f32 %v906_v1  ;;  %vm1065_vm9 = vcmp.le.f32.partialorder %v185_v29, 0.7853982 }
  0x5e   :  { %788 = vcosq.f32 %v170_v28  ;;  %v264_v45 = vor.u32 4788187, %v263_v23  ;;  %v267_v52 = vcvt.s32.f32 %v260_v48  ;;  %v1055_v57 = vshrl.u32 %v349_v53, 30 }
  0x5f   :  { %790 = vsinq.f32 %v170_v28  ;;  %vm187_vm10 = vcmp.lt.s32.totalorder %v908_v3, 0  ;;  %v64_v20 = vsel %vm62_vm7, %v63_v8, %v61_v58  ;;  %vm180_vm11 = vcmp.eq.s32.totalorder %v175_v54, 2 }
  0x60   :  { %792 = vlog2.f32 %v45_v38  ;;  %v265_v56 = vand.u32 2147483647, %v264_v45  ;;  %v351_v62 = vshll.u32 %v1055_v57, 30  ;;  %vm176_vm12 = vcmp.lt.s32.totalorder %v175_v54, 2 }
  0x61   :  { %794 = vrsqrt.f32 %v1051_v25  ;;  %vm177_vm13 = vcmp.eq.s32.totalorder %v175_v54, 0  ;;  %vm496_vm14 = vcmp.eq.s32.totalorder %v491_v27, 2  ;;  %v272_v10 = vsel %vm187_vm10, %v271_v60, %v990_v33 }
  0x62   :  { %v268_v59 = vmul.f32 %v267_v52, %v265_v56  ;;  %v352_v4 = vsub.s32 %v348_v49, %v351_v62  ;;  %vm492_vm15 = vcmp.lt.s32.totalorder %v491_v27, 2  ;;  %vm493_vm0 = vcmp.eq.s32.totalorder %v491_v27, 0 }
  0x63   :  { %v274_v33 = vsel %vm1065_vm9, 0, %v272_v10  ;;  %v344_v35 = vadd.s32 %v1030_v24, %v1038_v31  ;;  %vm67_vm2 = vcmp.eq.f32.partialorder %v1051_v25, inf  ;;  %vm69_vm3 = vcmp.eq.f32.partialorder %v1051_v25, 0.0 }
  0x64   :  { %v269_v63 = vxor.u32 2147483648, %v268_v59  ;;  %v354_v29 = vsub.s32 0, %v352_v4  ;;  %v594_v32 = vadd.s32 3, %v274_v33  ;;  %v278_v44 = vand.u32 3, %v274_v33 }
  0x65   :  { %v70_v21 = vand.u32 2147483648, %v1051_v25 }
  0x66   :  { %v270_v9 = vsel %vm187_vm10, %v269_v63, %v268_v59  ;;  %v742_v2 = vmin.u32 %v354_v29, %v352_v4  ;;  %v595_v47 = vand.u32 3, %v594_v32  ;;  %vm280_vm4 = vcmp.eq.s32.totalorder %v278_v44, 0 }
  0x67   :  { %v273_v13 = vsel %vm1065_vm9, %v908_v3, %v270_v9  ;;  %vm283_vm5 = vcmp.eq.s32.totalorder %v278_v44, 2  ;;  %vm277_vm10 = vweird.f32 %v908_v3 }
  0x68   :  { %796 = vcosq.f32 %v273_v13  ;;  %v356_v17 = vclz %v742_v2  ;;  %vm600_vm6 = vcmp.eq.s32.totalorder %v595_v47, 2  ;;  %vm597_vm7 = vcmp.eq.s32.totalorder %v595_v47, 0 }
  0x69   :  { %798 = vsinq.f32 %v273_v13  ;;  %vm596_vm9 = vcmp.lt.s32.totalorder %v595_v47, 2 }
  0x6a   :  { %v743_v30 = vadd.s32 4294967294, %v356_v17 }
  0x6b   :  { %v789_v37 = vpop.eup %788 }
  0x6c   :  { %v791_v5 = vpop.eup %790  ;;  %v181_v6 = vxor.u32 2147483648, %v789_v37  ;;  %vm744_vm1 = vcmp.lt.s32.totalorder %v743_v30, 0 }
  0x6d   :  { %v178_v7 = vxor.u32 2147483648, %v791_v5  ;;  %v793_v28 = vpop.eup %792  ;;  %v359_v36 = vsel %vm744_vm1, 0, %v743_v30 }
  0x6e   :  { %v182_v12 = vsel %vm180_vm11, %v181_v6, %v791_v5  ;;  %v498_v14 = vsel %vm496_vm14, %v181_v6, %v791_v5  ;;  %v795_v0 = vpop.eup %794  ;;  %v54_v39 = vmul.f32 0.6931472, %v793_v28  ;;  %v360_v40 = vsub.s32 32, %v359_v36 }
  0x6f   :  { %v179_v55 = vsel %vm177_vm13, %v789_v37, %v178_v7  ;;  %v495_v18 = vsel %vm493_vm0, %v789_v37, %v178_v7  ;;  %v361_v41 = vshll.u32 %v352_v4, %v359_v36  ;;  %v364_v42 = vsub.s32 4294967266, %v359_v36 }
  0x70   :  { %v183_v15 = vsel %vm176_vm12, %v179_v55, %v182_v12  ;;  %v499_v26 = vsel %vm492_vm15, %v495_v18, %v498_v14  ;;  %v66_v43 = vmul.f32 %v795_v0, %v1051_v25  ;;  %v362_v1 = vshrl.u32 %v344_v35, %v360_v40 }
  0x71   :  { %v184_v16 = vsel %vm174_vm8, nan, %v183_v15  ;;  %v500_v34 = vsel %vm174_vm8, nan, %v499_v26  ;;  %v365_v38 = vadd.s32 127, %v364_v42  ;;  %v1087_v24 = vmul.f32 -2.0, %v54_v39 }
  0x72   :  { %v391_v22 = vmul.f32 %v184_v16, %v64_v20  ;;  %v709_v61 = vmul.f32 %v500_v34, %v64_v20  ;;  %v363_v31 = vor.u32 %v362_v1, %v361_v41  ;;  %v68_v49 = vsel %vm67_vm2, %v1051_v25, %v66_v43 }
  0x73   :  { %v366_v48 = vshll.u32 %v365_v38, 23  ;;  %vm279_vm8 = vcmp.lt.s32.totalorder %v278_v44, 2  ;;  %v71_v58 = vsel %vm69_vm3, %v70_v21, %v68_v49  ;;  %800 = vrsqrt.f32 %v1087_v24 }
  0x74   :  { %394 = vst [vmem:[#allocation7] sm:$0xff] %v391_v22  ;;  %712 = vst [vmem:[#allocation7 + $0x8] sm:$0xff] %v709_v61  ;;  %v370_v52 = vcvt.s32.f32 %v363_v31  ;;  %vm290_vm11 = vcmp.lt.s32.totalorder %v927_v46, 0  ;;  %v374_v20 = vsub.s32 4, %v1055_v57  ;;  %vm289_vm12 = vcmp.le.f32.partialorder %v288_v11, 0.7853982 }
  0x75   :  { %v797_v23 = vpop.eup %796  ;;  %v367_v45 = vor.u32 4788187, %v366_v48  ;;  %vm74_vm13 = vcmp.eq.f32.partialorder %v1087_v24, inf  ;;  %vm76_vm14 = vcmp.eq.f32.partialorder %v1087_v24, 0.0  ;;  %v77_v2 = vand.u32 2147483648, %v1087_v24 }
  0x76   :  { %v799_v50 = vpop.eup %798  ;;  %v284_v51 = vxor.u32 2147483648, %v797_v23  ;;  %v375_v6 = vsel %vm290_vm11, %v374_v20, %v1055_v57 }
  0x77   :  { %v281_v53 = vxor.u32 2147483648, %v799_v50  ;;  %v368_v54 = vand.u32 2147483647, %v367_v45  ;;  %v377_v9 = vsel %vm289_vm12, 0, %v375_v6 }
  0x78   :  { %v285_v8 = vsel %vm283_vm5, %v284_v51, %v799_v50  ;;  %v602_v56 = vsel %vm600_vm6, %v284_v51, %v799_v50  ;;  %v698_v10 = vadd.s32 3, %v377_v9  ;;  %v381_v12 = vand.u32 3, %v377_v9 }
  0x79   :  { %v282_v27 = vsel %vm280_vm4, %v797_v23, %v281_v53  ;;  %v599_v59 = vsel %vm597_vm7, %v797_v23, %v281_v53  ;;  %v371_v62 = vmul.f32 %v370_v52, %v368_v54  ;;  %vm380_vm5 = vweird.f32 %v927_v46 }
  0x7a   :  { %v286_v60 = vsel %vm279_vm8, %v282_v27, %v285_v8  ;;  %v603_v19 = vsel %vm596_vm9, %v599_v59, %v602_v56  ;;  %v699_v13 = vand.u32 3, %v698_v10  ;;  %vm386_vm15 = vcmp.eq.s32.totalorder %v381_v12, 2 }
  0x7b   :  { %v287_v37 = vsel %vm277_vm10, nan, %v286_v60  ;;  %v604_v3 = vsel %vm277_vm10, nan, %v603_v19  ;;  %v372_v25 = vxor.u32 2147483648, %v371_v62  ;;  %vm383_vm1 = vcmp.eq.s32.totalorder %v381_v12, 0 }
  0x7c   :  { %v392_v63 = vmul.f32 %v287_v37, %v71_v58  ;;  %v710_v4 = vmul.f32 %v604_v3, %v71_v58  ;;  %vm704_vm0 = vcmp.eq.s32.totalorder %v699_v13, 2  ;;  %vm701_vm2 = vcmp.eq.s32.totalorder %v699_v13, 0 }
  0x7d   :  { %v373_v5 = vsel %vm290_vm11, %v372_v25, %v371_v62  ;;  %vm382_vm3 = vcmp.lt.s32.totalorder %v381_v12, 2  ;;  %vm700_vm4 = vcmp.lt.s32.totalorder %v699_v13, 2 }
  0x7e   :  { %395 = vst [vmem:[#allocation7 + $0x10] sm:$0xff] %v392_v63  ;;  %713 = vst [vmem:[#allocation7 + $0x18] sm:$0xff] %v710_v4  ;;  %v376_v7 = vsel %vm289_vm12, %v927_v46, %v373_v5 }
  0x7f   :  { %802 = vcosq.f32 %v376_v7 }
  0x80   :  { %804 = vsinq.f32 %v376_v7  ;;  %v801_v29 = vpop.eup %800 }
  0x81   :  { %v73_v55 = vmul.f32 %v801_v29, %v1087_v24 }
  0x83   :  { %v75_v14 = vsel %vm74_vm13, %v1087_v24, %v73_v55 }
  0x84   :  { %v78_v18 = vsel %vm76_vm14, %v77_v2, %v75_v14 }
  0x8c   :  { %v803_v11 = vpop.eup %802 }
  0x8d   :  { %v805_v57 = vpop.eup %804  ;;  %v387_v15 = vxor.u32 2147483648, %v803_v11 }
  0x8e   :  { %v384_v16 = vxor.u32 2147483648, %v805_v57 }
  0x8f   :  { %v388_v33 = vsel %vm386_vm15, %v387_v15, %v805_v57  ;;  %v706_v17 = vsel %vm704_vm0, %v387_v15, %v805_v57 }
  0x90   :  { %v385_v22 = vsel %vm383_vm1, %v803_v11, %v384_v16  ;;  %v703_v26 = vsel %vm701_vm2, %v803_v11, %v384_v16 }
  0x91   :  { %v389_v28 = vsel %vm382_vm3, %v385_v22, %v388_v33  ;;  %v707_v30 = vsel %vm700_vm4, %v703_v26, %v706_v17 }
  0x92   :  { %v390_v34 = vsel %vm380_vm5, nan, %v389_v28  ;;  %v708_v61 = vsel %vm380_vm5, nan, %v707_v30 }
  0x93   :  { %v393_v32 = vmul.f32 %v390_v34, %v78_v18  ;;  %v711_v0 = vmul.f32 %v708_v61, %v78_v18 }
  0x95   :  { %396 = vst [vmem:[#allocation7 + $0x20] sm:$0xff] %v393_v32  ;;  %714 = vst [vmem:[#allocation7 + $0x28] sm:$0xff] %v711_v0 }
  0x96   :  { %857 = shalt.err (!%p854_p0)
}
  0x97   :  { %s883_s22 = smov 256   ;;  %s884_s23 = smov 16  }
  0x98   :  { %726 = dma.vmem_to_hbm [thread:$0]  %s721_s1, 768, %s1112_s2, [#allocation4], %s883_s22, %s883_s22, %s884_s23  }
  0x99   :  { %870 = dma.done.wait [#allocation4], 768  }
  0x9a   :  { %871 = vsyncadd [#allocation4], 4294966528 }
  0x9b   :  { %730 = vsyncpa [#allocation3], 1 }
  0x9c   :  { %731 = vsyncpa [#allocation6], 1 }
  0x9d   :  { %732 = vsyncpa [#allocation4], 1 }

</bundles_post_ra>
